<compile_context>
chip_gen: v7x
topology: tpu7x:2x2x1
jax: 0.10.0
libtpu: 0.0.40
codegen_flags: <defaults>
</compile_context>

<pallas_src>
import math

import jax
import jax.numpy as jnp
from jax import lax
from jax.experimental import pallas as pl
from jax.experimental.pallas import tpu as pltpu


def _vmem_capacity_bytes() -> int:
    """Per-core VMEM capacity; falls back to the v7x floor (64 MiB)."""
    try:
        info = pltpu.get_tpu_info()
        cap = int(getattr(info, "vmem_capacity_bytes", 0) or 0)
        if cap > 0:
            return cap
    except Exception:
        pass
    return 64 * 2 ** 20


def _footprint_bytes(S, D, d_k, tq, tn, x_bytes, w_bytes, op_bytes):
    """Rough per-step VMEM footprint: double-buffered pipeline blocks + scratch
    + f32 live intermediates."""
    num_q = S // tq
    fp = 2 * S * D * x_bytes                 # resident x (pipeline allocates 2 bufs)
    fp += 2 * 2 * D * d_k * w_bytes          # WQ + WK (or packed WQ|WK)
    fp += 2 * D * S * w_bytes                # WV slab
    fp += 2 * S * tn * w_bytes               # WO tile
    fp += 2 * tq * tn * x_bytes              # output tile
    fp += tq * S * op_bytes                  # pv scratch
    if num_q > 1:
        fp += S * d_k * op_bytes             # cached K scratch
    fp += (2 * tq * S + tq * D + tq * d_k + S * d_k) * 4   # f32 intermediates
    return fp


def _select_tiles(S, D, d_k, x_bytes, w_bytes, op_bytes, budget):
    """Pick (TQ, TN) so the estimated footprint fits the per-generation budget."""
    # Query tile: full S for small problems, else capped at 256 (big TQ only
    # inflates the f32 (TQ, S) score rows / vreg pressure).
    if S <= 256:
        tq = S
    else:
        tq = S
        for cand in (256, 128, 64, 32, 16, 8):
            if S % cand == 0:
                tq = cand
                break

    def fits(tq_, tn_):
        return _footprint_bytes(S, D, d_k, tq_, tn_, x_bytes, w_bytes, op_bytes) <= budget

    # WO / output N tile: full S if it fits, else the largest lane-dense
    # (multiple-of-128) divisor that fits; best effort otherwise.
    tn = S
    if not fits(tq, tn):
        for cand in (2048, 1024, 512, 256, 128):
            if cand < S and S % cand == 0:
                tn = cand
                if fits(tq, cand):
                    break
    # Still over budget: shrink the query tile (stay a multiple of 8).
    while not fits(tq, tn) and tq > 8 and tq % 2 == 0 and (tq // 2) % 8 == 0:
        tq //= 2
    return tq, tn


def _make_kernel(*, d_k, tq, num_q, fused_qk, op_dtype, approx_reciprocal):
    def kernel(*refs):
        if fused_qk:
            x_ref, wqk_ref, wv_ref, wo_ref, o_ref, pv_sc = refs
        elif num_q == 1:
            x_ref, wq_ref, wk_ref, wv_ref, wo_ref, o_ref, pv_sc = refs
        else:
            x_ref, wq_ref, wk_ref, wv_ref, wo_ref, o_ref, k_sc, pv_sc = refs

        qi = pl.program_id(1)
        n = pl.program_id(2)

        if num_q > 1:
            # K depends only on the head: compute once per head and cache it in
            # VMEM scratch for every q-tile (qi axis is "arbitrary").
            @pl.when((qi == 0) & (n == 0))
            def _():
                x = x_ref[...].astype(op_dtype)
                k_sc[...] = jnp.dot(
                    x, wk_ref[0].astype(op_dtype),
                    preferred_element_type=jnp.float32).astype(op_dtype)

        @pl.when(n == 0)
        def _():
            # Everything up to pv = softmax(QK^T) @ X @ WV is independent of the
            # WO output tile `n`: compute it once per (head, q-tile).
            x = x_ref[...].astype(op_dtype)                         # (S, D)
            if fused_qk:
                # Lane-aligned split (d_k % 128 == 0): one fused projection.
                qk = jnp.dot(x, wqk_ref[0].astype(op_dtype),
                             preferred_element_type=jnp.float32)    # (S, 2*dk)
                q = qk[:, :d_k]                                     # scale already in WQ
                k = qk[:, d_k:].astype(op_dtype)
            elif num_q == 1:
                q = jnp.dot(x, wq_ref[0].astype(op_dtype),
                            preferred_element_type=jnp.float32)     # (S, dk)
                k = jnp.dot(x, wk_ref[0].astype(op_dtype),
                            preferred_element_type=jnp.float32).astype(op_dtype)
            else:
                q_start = pl.multiple_of(qi * tq, tq)
                xq = x_ref[pl.ds(q_start, tq), :].astype(op_dtype)  # (TQ, D)
                q = jnp.dot(xq, wq_ref[0].astype(op_dtype),
                            preferred_element_type=jnp.float32)     # (TQ, dk)
                k = k_sc[...]                                       # cached (S, dk)

            # scores = Q K^T, contracting last dims directly on the MXU (no
            # materialized transpose of K); 1/sqrt(dk) folded into WQ on host.
            scores = lax.dot_general(q.astype(op_dtype), k,
                                     (((1,), (1,)), ((), ())),
                                     preferred_element_type=jnp.float32)  # (TQ, S)

            # Row softmax in f32 (mandatory f32 VPU/EUP path on v5e).
            scores = scores - jnp.max(scores, axis=-1, keepdims=True)
            p = jnp.exp(scores)
            denom = jnp.sum(p, axis=-1, keepdims=True)
            if approx_reciprocal:
                p = p * pl.reciprocal(denom, approx=True)   # EUP vrcp slot
            else:
                p = p / denom                                # exact; hides under MXU work

            # softmax(..) @ V with V = X @ WV re-associated as (P @ X) @ WV, so
            # the (S, S) V matrix is never materialized.
            px = jnp.dot(p.astype(op_dtype), x,
                         preferred_element_type=jnp.float32)             # (TQ, D)
            pv_sc[...] = jnp.dot(px.astype(op_dtype), wv_ref[0].astype(op_dtype),
                                 preferred_element_type=jnp.float32
                                 ).astype(op_dtype)                       # (TQ, S)

        # Per-n step: one lane-dense (TQ, TN) tile of the final WO matmul.
        o_ref[0] = jnp.dot(pv_sc[...], wo_ref[0].astype(op_dtype),
                           preferred_element_type=jnp.float32).astype(o_ref.dtype)

    return kernel


def multi_head_self_attention(x, wq, wk, wv, wo, *, q_tile=None, n_tile=None,
                              mxu_dtype=None, approx_reciprocal=False):
    """x: [S, D]; wq/wk: [H, D, dk]; wv: [H, D, S]; wo: [H, S, S] -> [H, S, S]."""
    S, D = x.shape
    H, _, d_k = wq.shape
    assert wk.shape == (H, D, d_k)
    assert wv.shape == (H, D, S) and wo.shape == (H, S, S)

    op_dtype = jnp.dtype(mxu_dtype) if mxu_dtype is not None else jnp.dtype(x.dtype)
    x_bytes = jnp.dtype(x.dtype).itemsize
    w_bytes = jnp.dtype(op_dtype).itemsize     # weights pre-cast on the host
    op_bytes = jnp.dtype(op_dtype).itemsize

    capacity = _vmem_capacity_bytes()
    budget = int(0.75 * capacity)              # headroom for spill / compiler scratch
    tq_auto, tn_auto = _select_tiles(S, D, d_k, x_bytes, w_bytes, op_bytes, budget)
    tq = q_tile if q_tile is not None else tq_auto
    tn = n_tile if n_tile is not None else tn_auto
    assert S % tq == 0 and S % tn == 0, "tiles must divide S"
    num_q, num_n = S // tq, S // tn

    # Fold 1/sqrt(d_k) into WQ on the host (removes a per-step VPU multiply);
    # pre-cast all weight slabs to the MXU operand dtype.
    scale = 1.0 / math.sqrt(float(d_k))
    wq = (wq.astype(jnp.float32) * scale).astype(op_dtype)
    wk = wk.astype(op_dtype)
    wv = wv.astype(op_dtype)
    wo = wo.astype(op_dtype)

    # Fused WQ|WK projection only when the lane split is 128-aligned and the
    # whole sequence is a single q tile; otherwise two separate matmuls win.
    fused_qk = (num_q == 1) and (d_k % 128 == 0)

    kernel = _make_kernel(d_k=d_k, tq=tq, num_q=num_q, fused_qk=fused_qk,
                          op_dtype=op_dtype, approx_reciprocal=approx_reciprocal)

    # x: invariant index_map -> DMA'd into VMEM exactly once (double-buffered by
    # the default pipeline; single-buffering it is a possible further VMEM win).
    x_spec = pl.BlockSpec((S, D), lambda h, qi, n: (0, 0))
    if fused_qk:
        wqk = jnp.concatenate([wq, wk], axis=-1)            # (H, D, 2*dk)
        weight_inputs = (wqk,)
        weight_specs = [pl.BlockSpec((1, D, 2 * d_k), lambda h, qi, n: (h, 0, 0))]
    else:
        weight_inputs = (wq, wk)
        weight_specs = [pl.BlockSpec((1, D, d_k), lambda h, qi, n: (h, 0, 0)),
                        pl.BlockSpec((1, D, d_k), lambda h, qi, n: (h, 0, 0))]

    in_specs = ([x_spec] + weight_specs + [
        pl.BlockSpec((1, D, S), lambda h, qi, n: (h, 0, 0)),      # WV slab (per head)
        pl.BlockSpec((1, S, tn), lambda h, qi, n: (h, 0, n)),     # WO streamed in N tiles
    ])
    out_specs = pl.BlockSpec((1, tq, tn), lambda h, qi, n: (h, qi, n))

    scratch_shapes = []
    if num_q > 1:
        scratch_shapes.append(pltpu.VMEM((S, d_k), op_dtype))     # cached K per head
    scratch_shapes.append(pltpu.VMEM((tq, S), op_dtype))          # pv = softmax(..)@X@WV

    grid_spec = pltpu.PrefetchScalarGridSpec(
        num_scalar_prefetch=0,
        grid=(H, num_q, num_n),
        in_specs=in_specs,
        out_specs=out_specs,
        scratch_shapes=scratch_shapes,
    )

    footprint = _footprint_bytes(S, D, d_k, tq, tn, x_bytes, w_bytes, op_bytes)
    vmem_limit = int(min(capacity, max(32 * 2 ** 20, 2 * footprint)))

    return pl.pallas_call(
        kernel,
        out_shape=jax.ShapeDtypeStruct((H, S, S), x.dtype),
        grid_spec=grid_spec,
        compiler_params=pltpu.CompilerParams(
            # h: sharded across TensorCores (v7x megacore); qi/n carry VMEM
            # scratch (cached K, pv) so they must stay "arbitrary".
            dimension_semantics=("parallel", "arbitrary", "arbitrary"),
            vmem_limit_bytes=vmem_limit,
        ),
    )(x, *weight_inputs, wv, wo)


def _reference(x, wq, wk, wv, wo):
    """Plain-JAX reference mirroring the PyTorch forward (f32-accurate matmuls)."""
    d_k = wq.shape[-1]
    with jax.default_matmul_precision("highest"):
        xb = x[None]                                    # [1, S, D]
        q = jnp.matmul(xb, wq)                          # [H, S, dk]
        k = jnp.matmul(xb, wk)                          # [H, S, dk]
        v = jnp.matmul(xb, wv)                          # [H, S, S]
        scores = jnp.matmul(q, jnp.swapaxes(k, -1, -2)) / jnp.sqrt(jnp.float32(d_k))
        p = jax.nn.softmax(scores, axis=-1)
        attn = jnp.matmul(p, v)                         # [H, S, S]
        return jnp.matmul(attn, wo)                     # [H, S, S]


if __name__ == "__main__":
    # Small, deterministic shapes consistent with the module: input_size = [S, D]
    heads, S, D, d_k = 2, 16, 32, 8

    key = jax.random.PRNGKey(0)
    kx, kq, kk, kv, ko = jax.random.split(key, 5)

    # torch.rand -> uniform [0, 1)
    x = jax.random.uniform(kx, (S, D), dtype=jnp.float32)
    WQ = jax.random.uniform(kq, (heads, D, d_k), dtype=jnp.float32)
    WK = jax.random.uniform(kk, (heads, D, d_k), dtype=jnp.float32)
    WV = jax.random.uniform(kv, (heads, D, S), dtype=jnp.float32)
    WO = jax.random.uniform(ko, (heads, S, S), dtype=jnp.float32)

    out = multi_head_self_attention(x, WQ, WK, WV, WO)
    out = jax.block_until_ready(out)

    ref = _reference(x, WQ, WK, WV, WO)
    assert out.shape == (heads, S, S)
    # f32 MXU path + exact softmax divide: tolerance tightened 5x vs. the
    # previous approx-reciprocal configuration.
    assert jnp.allclose(out, ref, rtol=2e-3, atol=2e-3), "mismatch vs reference"

    # bf16-MXU fast path (v5e/v6e/v7x): bf16 operands, f32 accumulation, f32
    # softmax.  Only sanity-checked (shape / finiteness): the un-normalized
    # torch.rand test problem has a near-one-hot softmax, so a tight elementwise
    # bf16-vs-f32 comparison is not meaningful at these magnitudes.
    out_bf16 = multi_head_self_attention(x, WQ, WK, WV, WO, mxu_dtype=jnp.bfloat16)
    out_bf16 = jax.block_until_ready(out_bf16)
    assert out_bf16.shape == (heads, S, S)
    assert bool(jnp.all(jnp.isfinite(out_bf16)))

    print("KERNEL_OK")
</pallas_src>

<mosaic_0001>
module attributes {stable_mosaic.version = 11 : i64} {
  func.func @kernel(%arg0: i32, %arg1: i32, %arg2: i32, %arg3: memref<16x32xf32, #tpu.memory_space<vmem>>, %arg4: memref<1x32x8xf32, #tpu.memory_space<vmem>>, %arg5: memref<1x32x8xf32, #tpu.memory_space<vmem>>, %arg6: memref<1x32x16xf32, #tpu.memory_space<vmem>>, %arg7: memref<1x16x16xf32, #tpu.memory_space<vmem>>, %arg8: memref<1x16x16xf32, #tpu.memory_space<vmem>>, %arg9: memref<16x16xf32, #tpu.memory_space<vmem>>) attributes {dimension_semantics = [#tpu.dimension_semantics<parallel>, #tpu.dimension_semantics<arbitrary>, #tpu.dimension_semantics<arbitrary>], iteration_bounds = array<i64: 2, 1, 1>, scalar_prefetch = 0 : i64, scratch_operands = 1 : i64, tpu.core_type = #tpu.core_type<tc>, window_params = [{pipeline_mode = #tpu.pipeline_mode<synchronous>, transform_indices = @transform_0, window_bounds = array<i64: 16, 32>}, {transform_indices = @transform_1, window_bounds = array<i64: 1, 32, 8>}, {transform_indices = @transform_2, window_bounds = array<i64: 1, 32, 8>}, {transform_indices = @transform_3, window_bounds = array<i64: 1, 32, 16>}, {transform_indices = @transform_4, window_bounds = array<i64: 1, 16, 16>}, {transform_indices = @transform_5, window_bounds = array<i64: 1, 16, 16>}]} {
    %c0_i32 = arith.constant 0 : i32
    %0 = arith.cmpi eq, %arg2, %c0_i32 : i32
    %1 = arith.extui %0 : i1 to i32
    %c0_i32_0 = arith.constant 0 : i32
    %2 = arith.cmpi ne, %1, %c0_i32_0 : i32
    scf.if %2 {
      %c0_8 = arith.constant 0 : index
      %c0_9 = arith.constant 0 : index
      %10 = vector.load %arg3[%c0_8, %c0_9] : memref<16x32xf32, #tpu.memory_space<vmem>>, vector<16x32xf32>
      %c0_10 = arith.constant 0 : index
      %c0_11 = arith.constant 0 : index
      %c0_12 = arith.constant 0 : index
      %11 = vector.load %arg4[%c0_10, %c0_11, %c0_12] : memref<1x32x8xf32, #tpu.memory_space<vmem>>, vector<1x32x8xf32>
      %12 = vector.shape_cast %11 : vector<1x32x8xf32> to vector<32x8xf32>
      %cst_13 = arith.constant dense<0.000000e+00> : vector<16x8xf32>
      %13 = tpu.matmul %10, %12, %cst_13 {dimension_numbers = #tpu.dot_dimension_numbers<[1], [0], [0], [1], [0, 0, 1, 1], [], []>} : vector<16x32xf32>, vector<32x8xf32>, vector<16x8xf32> -> vector<16x8xf32>
      %c0_14 = arith.constant 0 : index
      %c0_15 = arith.constant 0 : index
      %c0_16 = arith.constant 0 : index
      %14 = vector.load %arg5[%c0_14, %c0_15, %c0_16] : memref<1x32x8xf32, #tpu.memory_space<vmem>>, vector<1x32x8xf32>
      %15 = vector.shape_cast %14 : vector<1x32x8xf32> to vector<32x8xf32>
      %cst_17 = arith.constant dense<0.000000e+00> : vector<16x8xf32>
      %16 = tpu.matmul %10, %15, %cst_17 {dimension_numbers = #tpu.dot_dimension_numbers<[1], [0], [0], [1], [0, 0, 1, 1], [], []>} : vector<16x32xf32>, vector<32x8xf32>, vector<16x8xf32> -> vector<16x8xf32>
      %cst_18 = arith.constant dense<0.000000e+00> : vector<16x16xf32>
      %17 = tpu.matmul %13, %16, %cst_18 {dimension_numbers = #tpu.dot_dimension_numbers<[1], [1], [0], [0], [0, 0, 1, 0], [], []>} : vector<16x8xf32>, vector<16x8xf32>, vector<16x16xf32> -> vector<16x16xf32>
      %cst_19 = arith.constant dense<0xFF800000> : vector<16xf32>
      %18 = vector.multi_reduction <maximumf>, %17, %cst_19 [1] : vector<16x16xf32> to vector<16xf32>
      %19 = vector.shape_cast %18 : vector<16xf32> to vector<16x1xf32>
      %20 = vector.broadcast %19 : vector<16x1xf32> to vector<16x16xf32>
      %21 = arith.subf %17, %20 : vector<16x16xf32>
      %22 = math.exp %21 : vector<16x16xf32>
      %cst_20 = arith.constant dense<0.000000e+00> : vector<16xf32>
      %23 = vector.multi_reduction <add>, %22, %cst_20 [1] : vector<16x16xf32> to vector<16xf32>
      %24 = vector.shape_cast %23 : vector<16xf32> to vector<16x1xf32>
      %25 = vector.broadcast %24 : vector<16x1xf32> to vector<16x16xf32>
      %26 = arith.divf %22, %25 : vector<16x16xf32>
      %cst_21 = arith.constant dense<0.000000e+00> : vector<16x32xf32>
      %27 = tpu.matmul %26, %10, %cst_21 {dimension_numbers = #tpu.dot_dimension_numbers<[1], [0], [0], [1], [0, 0, 1, 1], [], []>} : vector<16x16xf32>, vector<16x32xf32>, vector<16x32xf32> -> vector<16x32xf32>
      %c0_22 = arith.constant 0 : index
      %c0_23 = arith.constant 0 : index
      %c0_24 = arith.constant 0 : index
      %28 = vector.load %arg6[%c0_22, %c0_23, %c0_24] : memref<1x32x16xf32, #tpu.memory_space<vmem>>, vector<1x32x16xf32>
      %29 = vector.shape_cast %28 : vector<1x32x16xf32> to vector<32x16xf32>
      %cst_25 = arith.constant dense<0.000000e+00> : vector<16x16xf32>
      %30 = tpu.matmul %27, %29, %cst_25 {dimension_numbers = #tpu.dot_dimension_numbers<[1], [0], [0], [1], [0, 0, 1, 1], [], []>} : vector<16x32xf32>, vector<32x16xf32>, vector<16x16xf32> -> vector<16x16xf32>
      %c0_26 = arith.constant 0 : index
      %c0_27 = arith.constant 0 : index
      %31 = vector.load %arg9[%c0_26, %c0_27] : memref<16x16xf32, #tpu.memory_space<vmem>>, vector<16x16xf32>
      tpu.vector_store %arg9[%c0_26, %c0_27], %30 {strides = array<i32>} : memref<16x16xf32, #tpu.memory_space<vmem>>, vector<16x16xf32>,
    } else {
    }
    %c0 = arith.constant 0 : index
    %c0_1 = arith.constant 0 : index
    %3 = vector.load %arg9[%c0, %c0_1] : memref<16x16xf32, #tpu.memory_space<vmem>>, vector<16x16xf32>
    %c0_2 = arith.constant 0 : index
    %c0_3 = arith.constant 0 : index
    %c0_4 = arith.constant 0 : index
    %4 = vector.load %arg7[%c0_2, %c0_3, %c0_4] : memref<1x16x16xf32, #tpu.memory_space<vmem>>, vector<1x16x16xf32>
    %5 = vector.shape_cast %4 : vector<1x16x16xf32> to vector<16x16xf32>
    %cst = arith.constant dense<0.000000e+00> : vector<16x16xf32>
    %6 = tpu.matmul %3, %5, %cst {dimension_numbers = #tpu.dot_dimension_numbers<[1], [0], [0], [1], [0, 0, 1, 1], [], []>} : vector<16x16xf32>, vector<16x16xf32>, vector<16x16xf32> -> vector<16x16xf32>
    %c0_5 = arith.constant 0 : index
    %c0_6 = arith.constant 0 : index
    %c0_7 = arith.constant 0 : index
    %7 = vector.load %arg8[%c0_5, %c0_6, %c0_7] : memref<1x16x16xf32, #tpu.memory_space<vmem>>, vector<1x16x16xf32>
    %8 = vector.shape_cast %7 : vector<1x16x16xf32> to vector<16x16xf32>
    %9 = vector.shape_cast %6 : vector<16x16xf32> to vector<1x16x16xf32>
    tpu.vector_store %arg8[%c0_5, %c0_6, %c0_7], %9 {strides = array<i32>} : memref<1x16x16xf32, #tpu.memory_space<vmem>>, vector<1x16x16xf32>,
    return
  }
  func.func @transform_0(%arg0: i32, %arg1: i32, %arg2: i32) -> (i32, i32) {
    %c0_i32 = arith.constant 0 : i32
    %c0_i32_0 = arith.constant 0 : i32
    %c0_i32_1 = arith.constant 0 : i32
    return %c0_i32, %c0_i32_0 : i32, i32
  }
  func.func @transform_1(%arg0: i32, %arg1: i32, %arg2: i32) -> (i32, i32, i32) {
    %c0_i32 = arith.constant 0 : i32
    %c0_i32_0 = arith.constant 0 : i32
    %c0_i32_1 = arith.constant 0 : i32
    return %arg0, %c0_i32, %c0_i32_0 : i32, i32, i32
  }
  func.func @transform_2(%arg0: i32, %arg1: i32, %arg2: i32) -> (i32, i32, i32) {
    %c0_i32 = arith.constant 0 : i32
    %c0_i32_0 = arith.constant 0 : i32
    %c0_i32_1 = arith.constant 0 : i32
    return %arg0, %c0_i32, %c0_i32_0 : i32, i32, i32
  }
  func.func @transform_3(%arg0: i32, %arg1: i32, %arg2: i32) -> (i32, i32, i32) {
    %c0_i32 = arith.constant 0 : i32
    %c0_i32_0 = arith.constant 0 : i32
    %c0_i32_1 = arith.constant 0 : i32
    return %arg0, %c0_i32, %c0_i32_0 : i32, i32, i32
  }
  func.func @transform_4(%arg0: i32, %arg1: i32, %arg2: i32) -> (i32, i32, i32) {
    %c0_i32 = arith.constant 0 : i32
    %c0_i32_0 = arith.constant 0 : i32
    return %arg0, %c0_i32, %arg2 : i32, i32, i32
  }
  func.func @transform_5(%arg0: i32, %arg1: i32, %arg2: i32) -> (i32, i32, i32) {
    %c0_i32 = arith.constant 0 : i32
    return %arg0, %arg1, %arg2 : i32, i32, i32
  }
}

</mosaic_0001>

<bundles_post_ra>
// kernel: tpu_custom_call.1
= control target key start
LH: loop header
LB: loop body
LE: loop exit
PB: predicated region body
PF: predicated region fallthrough
CT: control target
= control target key end

     0   :  { %10 = vsyncpa [#allocation4], 0  ;;  %s1492_s0 = inlined_call_operand.vmem [shape: f32[16,32], index: 0, kind: input, shape index: {}]   ;;  %s1493_s1 = inlined_call_operand.vmem [shape: f32[2,32,8], index: 1, kind: input, shape index: {}]   ;;  %s1494_s2 = inlined_call_operand.vmem [shape: f32[2,32,8], index: 2, kind: input, shape index: {}]   ;;  %s1495_s3 = inlined_call_operand.vmem [shape: f32[2,32,16], index: 3, kind: input, shape index: {}]   ;;  %s1496_s4 = inlined_call_operand.vmem [shape: f32[2,16,16], index: 4, kind: input, shape index: {}]   ;;  %s1497_s5 = inlined_call_operand.hbm [shape: f32[2,16,16], index: 5, kind: output, shape index: {}]  }
   0x1   :  { %12 = vsyncpa [#allocation4 + $0x1], 0  ;;  %s1330_s18 = smov 0   ;;  %s1332_s19 = smov 0  }
   0x2   :  { %s1334_s20 = smov 0   ;;  %s1336_s21 = smov 0  }
   0x3   :  { %s1338_s22 = smov 0   ;;  %s1340_s23 = smov 0  }
   0x4 LB: > { %s992_s24 = sadd.s32 4294967295, %s1295_s23   ;;  %s993_s25 = sadd.s32 4294967294, %s1295_s23   ;;  %s1295_s23 = sphi %s1340_s23, %s18_s23   ;;  %s1291_s22 = sphi %s1338_s22, %s1504_s22   ;;  %s1287_s21 = sphi %s1336_s21, %s1503_s21   ;;  %s1283_s20 = sphi %s1334_s20, %s1502_s20   ;;  %s1279_s19 = sphi %s1332_s19, %s1501_s19   ;;  %s1275_s18 = sphi %s1330_s18, %s1500_s18  }
   0x5   : > { %s37_s26 = sadd.s32 1, %s1291_s22  ;;  %s175_s27 = sadd.s32 1, %s1283_s20 }
   0x6   : > { %p39_p0 = scmp.ge.s32.totalorder %s37_s26, 2  ;;  %p185_p1 = scmp.ne.s32.totalorder %s1283_s20, %s1279_s19 }
   0x7   : > { %p186_p2 = scmp.eq.s32.totalorder %s992_s24, 1  ;;  %p191_p3 = scmp.ne.s32.totalorder %s1279_s19, %s1275_s18 }
   0x8   : > { %s1506_s26 = smov (%p39_p0, %s37_s26), 0  ;;  %p192_p5 = scmp.eq.s32.totalorder %s993_s25, 1 }
   0x9   : > { %p1370_p4 = por %p186_p2, %p185_p1  ;;  %s168_s29 = ssub.s32 %s1291_s22, %s1506_s26 }
   0xa   : > { %p996_p6 = scmp.ge.s32.totalorder %s1295_s23, 1  ;;  %p173_p7 = scmp.eq.s32.totalorder %s168_s29, 0 }
   0xb   : > { %p1377_p8 = por %p192_p5, %p191_p3  ;;  %p248_p9 = scmp.lt.s32.totalorder %s1295_s23, 3 }
   0xc   : > { %s1383_s6 = scalar_select %p173_p7, %s1283_s20, %s175_s27  }
   0xd   : > { %p249_p10 = pnand %p996_p6, %p248_p9 }
   0xe   : > { %p294_p11 = scmp.lt.s32.totalorder (!%p249_p10), %s1287_s21, 1  ;;  %v1389_v0 = vld [vmem:[%s1492_s0] sm:$0xff] (!%p249_p10)  ;;  %vm328_vm0 = vcmask (!%p249_p10), 261120   ;;  %v323_v13 = vld [vmem:[%s1492_s0 + $0x8] sm:$0xff] (!%p249_p10)  ;;  %vm489_vm1 = vcmask (!%p249_p10), 64512   ;;  %vm577_vm3 = vcmask (!%p249_p10), 130048  }
   0xf   : > { %252 = sbr.rel (%p249_p10) target bundleno = 1455 (0x5af), region = 40  ;;  %1079 = vmatprep.mubr.msk.f32.mxu1 (!%p249_p10), %vm328_vm0, %v1389_v0  ;;  %1068 = vmatprep.mubr.msk.f32.mxu0 (!%p249_p10), %vm328_vm0, %v1389_v0  ;;  %vm1131_vm2 = vmpackc.low (!%p249_p10), %vm489_vm1, %vm489_vm1  ;;  %v1136_v33 = vpack.c.bf16 (!%p249_p10), %v323_v13, %v1389_v0  ;;  %s1029_s15 = sshll.u32 (!%p249_p10), %s1287_s21, 8 }
  0x10   : > { %s1442_s24 = scalar_lea.hbm (!%p249_p10), %s1497_s5, %s1029_s15 }
  0x16   : > { %s1396_s9 = scalar_select %p294_p11, %s1287_s21, 1 }
  0x17   : > { %s1297_s21 = smov [#allocation3]  }
  0x18   : > { %s1399_s10 = sshll.u32 %s1396_s9, 5  ;;  %s1028_s7 = sshll.u32 %s1396_s9, 4 }
  0x19   : > { %s303_s13 = scalar_lea.vmem %s1494_s2, %s1399_s10  ;;  %s298_s16 = scalar_lea.vmem %s1493_s1, %s1399_s10 }
  0x1a   : > { %v410_v1 = vld [vmem:[%s303_s13] sm:$0xff]  ;;  %v411_v2 = vld [vmem:[%s303_s13 + $0x8] sm:$0xff]  ;;  %v412_v3 = vld [vmem:[%s303_s13 + $0x10] sm:$0xff]  ;;  %s308_s29 = scalar_lea.vmem %s1495_s3, %s1399_s10  ;;  %s316_s11 = scalar_lea.vmem %s1496_s4, %s1028_s7 }
  0x1b   : > { %v1122_v4 = vpack.c.bf16 %v411_v2, %v410_v1  ;;  %v413_v5 = vld [vmem:[%s303_s13 + $0x18] sm:$0xff]  ;;  %v324_v6 = vld [vmem:[%s298_s16] sm:$0xff]  ;;  %v325_v7 = vld [vmem:[%s298_s16 + $0x8] sm:$0xff]  ;;  %s291_s9 = sand.u32 1, %s1279_s19  }
  0x1c   : > { %v1126_v8 = vpack.c.bf16 %v413_v5, %v412_v3  ;;  %v1114_v9 = vpack.c.bf16 %v325_v7, %v324_v6  ;;  %v326_v10 = vld [vmem:[%s298_s16 + $0x10] sm:$0xff]  ;;  %v327_v11 = vld [vmem:[%s298_s16 + $0x18] sm:$0xff]  ;;  %v681_v34 = vld [vmem:[%s308_s29] sm:$0xff]  ;;  %s997_s12 = sshll.u32 %s291_s9, 4  ;;  %s1446_s25 = scalar_lea.sflag [#allocation4], %s291_s9 }
  0x1d   : > { %1123 = vmatprep.subr.bf16.mxu1 %v1122_v4  ;;  %v1118_v12 = vpack.c.bf16 %v327_v11, %v326_v10  ;;  %v682_v35 = vld [vmem:[%s308_s29 + $0x8] sm:$0xff]  ;;  %v683_v41 = vld [vmem:[%s308_s29 + $0x10] sm:$0xff]  ;;  %v684_v42 = vld [vmem:[%s308_s29 + $0x18] sm:$0xff]  ;;  %s293_s13 = scalar_lea.vmem [#allocation3], %s997_s12  ;;  %s1221_s29 = sshll.u32 %s1297_s21, 4  ;;  %s1222_s29 = int_to_ptr.vmem [resolvable:$false] %s1221_s29 }
  0x1e   : > { %1125 = vmatpush3.bf16.msra.mxu1 %v1122_v4  ;;  %1115 = vmatprep.subr.bf16.mxu0 %v1114_v9  ;;  %v1140_v36 = vpack.c.bf16 %v682_v35, %v681_v34  ;;  %v1144_v45 = vpack.c.bf16 %v684_v42, %v683_v41  ;;  %v770_v48 = vld [vmem:[%s316_s11] sm:$0xff]  ;;  %v771_v49 = vld [vmem:[%s316_s11 + $0x8] sm:$0xff]  ;;  %s873_s14 = sshll.u32 %s293_s13, 4  ;;  %s1223_s7 = scalar_lea.vmem %s1222_s29, 512  ;;  %s1437_s14 = int_to_ptr.vmem [resolvable:$true] %s873_s14 }
  0x1f   : > { %1127 = vmatprep.subr.bf16.mxu1 %v1126_v8  ;;  %1117 = vmatpush3.bf16.msra.mxu0 %v1114_v9  ;;  %v1148_v50 = vpack.c.bf16 %v771_v49, %v770_v48  ;;  %s1217_s27 = scalar_lea.vmem %s1437_s14, 256  ;;  %p1224_p1 = scmp.lt.s32.totalorder %s1437_s14, %s1222_s29 }
  0x20   : > { %1119 = vmatprep.subr.bf16.mxu0 %v1118_v12  ;;  %p1218_p12 = scmp.ne.s32.totalorder %s1437_s14, %s1217_s27  ;;  %p1225_p2 = scmp.lt.s32.totalorder %s1223_s7, %s1217_s27 }
  0x22   : > { %1129 = vmatpush3.bf16.msra.mxu1 %v1126_v8  ;;  %p1219_p13 = pnand %p1218_p12, %p1370_p4  ;;  %p1226_p3 = por %p1225_p2, %p1224_p1 }
  0x23   : > { %1121 = vmatpush3.bf16.msra.mxu0 %v1118_v12  ;;  %1137 = vmatprep.subr.bf16.mxu1 %v1136_v33 }
  0x24   : > { %p1220_p0 = pneg %p1219_p13 }
  0x25   : > { %1080 = vmatmul.mubr.msk.f32.vlgmr.msra.gmra.mrb[0].mxu1 %vm328_vm0, %v323_v13 }
  0x26   : > { %1069 = vmatmul.mubr.msk.f32.vlgmr.msra.gmra.mrb[0].mxu0 %vm328_vm0, %v323_v13  ;;  %1139 = vmatpush3.bf16.msra.mxu1 %v1136_v33  ;;  %p1227_p5 = pnand %p1226_p3, %p1220_p0 }
  0x27   : > { %1141 = vmatprep.subr.bf16.mxu1 %v1140_v36 }
  0xf8   : > { %v1081_v14 = vpop.f32.mrb[0].mxu1 }
  0xf9   : > { %v480_v15 = vpop.f32.mrb[1].mxu1  ;;  %v1070_v16 = vpop.f32.mrb[0].mxu0 }
  0xfa   : > { %v1130_v17 = vpack.c.bf16 %v1081_v14, %v480_v15  ;;  %v401_v18 = vpop.f32.mrb[1].mxu0 }
  0xfb   : > { %1086 = vmatprep.mubr.msk.f32.mxu0 %vm489_vm1, %v401_v18 }
  0xfc   : > { %1132 = vmatprep.subr.msk.bf16.mxu0 %vm1131_vm2, %v1130_v17 }
  0xfd   : > { %1135 = vmatpush3.bf16.xpose.msk.msra.mxu0 %vm1131_vm2, %v1130_v17 }
  0xfe   : > { %1149 = vmatprep.subr.bf16.mxu0 %v1148_v50 }
 0x104   : > { %1087 = vmatmul.mubr.msk.f32.vlgmr.msra.gmra.mrb[2].mxu0 %vm489_vm1, %v1070_v16 }
 0x105   : > { %1151 = vmatpush3.bf16.msra.mxu0 %v1148_v50 }
 0x1d7   : > { %v1088_v19 = vpop.f32.mrb[2].mxu0 }
 0x1d8   : > { %v568_v20 = vpop.f32.mrb[3].mxu0  ;;  %v581_v22 = vsel %vm577_vm3, %v1088_v19, -inf }
 0x1d9   : > { %v578_v21 = vsel %vm577_vm3, %v568_v20, -inf }
 0x1da   : > { %579 = vmax.xlane.f32.xlu0 %v578_v21 }
 0x1de   : > { %582 = vmax.xlane.f32.xlu0 %v581_v22 }
 0x267   : > { %v580_v23 = vpop.xlane.xlu0 %579 }
 0x268   : > { %v584_v24 = vsub.f32 %v568_v20, %v580_v23 }
 0x26a   : > { %v586_v25 = vmul.f32 1.442695, %v584_v24 }
 0x26b   : > { %v583_v26 = vpop.xlane.xlu0 %582 }
 0x26c   : > { %1209 = vpow2.f32 %v586_v25  ;;  %v585_v27 = vsub.f32 %v1088_v19, %v583_v26 }
 0x26e   : > { %v588_v28 = vmul.f32 1.442695, %v585_v27 }
 0x270   : > { %1211 = vpow2.f32 %v588_v28 }
 0x276   : > { %v1210_v29 = vpop.eup %1209 }
 0x277   : > { %v590_v30 = vsel %vm577_vm3, %v1210_v29, 0.0 }
 0x278   : > { %591 = vadd.xlane.f32.xlu1 %v590_v30 }
 0x27a   : > { %v1212_v31 = vpop.eup %1211 }
 0x27b   : > { %v593_v32 = vsel %vm577_vm3, %v1212_v31, 0.0 }
 0x27c   : > { %594 = vadd.xlane.f32.xlu1 %v593_v32 }
 0x305   : > { %v592_v37 = vpop.xlane.xlu1 %591 }
 0x306   : > { %1213 = vrcp.f32 %v592_v37 }
 0x309   : > { %v595_v38 = vpop.xlane.xlu1 %594 }
 0x30a   : > { %1215 = vrcp.f32 %v595_v38 }
 0x310   : > { %v1214_v39 = vpop.eup %1213 }
 0x311   : > { %v597_v40 = vmul.f32 %v1214_v39, %v1210_v29 }
 0x313   : > { %1093 = vmatprep.mubr.msk.f32.mxu1 %vm577_vm3, %v597_v40 }
 0x314   : > { %v1216_v43 = vpop.eup %1215 }
 0x315   : > { %v599_v44 = vmul.f32 %v1216_v43, %v1212_v31 }
 0x317   : > { %1094 = vmatmul.mubr.msk.f32.vlgmr.msra.gmra.mrb[2].mxu1 %vm577_vm3, %v599_v44 }
 0x318   : > { %1143 = vmatpush3.bf16.msra.mxu1 %v1140_v36 }
 0x319   : > { %1145 = vmatprep.subr.bf16.mxu1 %v1144_v45 }
 0x31c   : > { %1147 = vmatpush3.bf16.msra.mxu1 %v1144_v45 }
 0x3ea   : > { %v1095_v46 = vpop.f32.mrb[2].mxu1 }
 0x3eb   : > { %v672_v47 = vpop.f32.mrb[3].mxu1 }
 0x3ec   : > { %1104 = vmatprep.mubr.msk.f32.mxu1 %vm328_vm0, %v672_v47 }
 0x3ed   : > { %1105 = vmatmul.mubr.msk.f32.vlgmr.msra.gmra.mrb[4].mxu1 %vm328_vm0, %v1095_v46 }
 0x4c0   : > { %v1106_v51 = vpop.f32.mrb[4].mxu1 }
 0x4c1   : > { %767 = vst.msk [vmem:[#allocation2 + $0x8] sm:$0xff] %vm577_vm3, %v1106_v51  ;;  %v757_v52 = vpop.f32.mrb[5].mxu1 }
 0x4c2   : > { %766 = vst.msk [vmem:[#allocation2] sm:$0xff] %vm577_vm3, %v757_v52 }
 0x4c8   : > { %v769_v54 = vld [vmem:[#allocation2 + $0x8] sm:$0xff] }
 0x4c9   : > { %v768_v53 = vld [vmem:[#allocation2] sm:$0xff] }
 0x4ca   : > { %1111 = vmatprep.mubr.msk.f32.mxu0 %vm577_vm3, %v768_v53 }
 0x4cb   : > { %1112 = vmatmul.mubr.msk.f32.vlgmr.msra.gmra.mrb[4].mxu0 %vm577_vm3, %v769_v54 }
 0x59e   : > { %v1113_v55 = vpop.f32.mrb[4].mxu0 }
 0x59f   : > { %855 = vst.msk [vmem:[%s293_s13 + $0x8] sm:$0xff] %vm577_vm3, %v1113_v55  ;;  %v845_v56 = vpop.f32.mrb[5].mxu0 }
 0x5a0   : > { %854 = vst.msk [vmem:[%s293_s13] sm:$0xff] %vm577_vm3, %v845_v56 }
 0x5a1   : > { %1230 = shalt.err (!%p1227_p5)
}
 0x5a2   : > { %s1231_s8 = scalar_lea.hbm %s1442_s24, 256  ;;  %s1235_s9 = scalar_lea.hbm %s1497_s5, 512 }
 0x5a3   : > { %p1232_p6 = scmp.ne.s32.totalorder %s1442_s24, %s1231_s8  ;;  %p1236_p10 = scmp.lt.u32.totalorder %s1442_s24, %s1497_s5 }
 0x5a4   : > { %p1237_p11 = scmp.lt.u32.totalorder %s1235_s9, %s1231_s8  ;;  %p1239_p13 = scmp.lt.u32.totalorder %s1231_s8, %s1442_s24 }
 0x5a5   : > { %p1233_p7 = pnand %p1232_p6, %p1370_p4 }
 0x5a6   : > { %p1238_p12 = por %p1237_p11, %p1236_p10 }
 0x5a7   : > { %p1234_p9 = pneg %p1233_p7 }
 0x5a8   : > { %p1240_p0 = por %p1239_p13, %p1238_p12 }
 0x5aa   : > { %p1241_p1 = pnand %p1240_p0, %p1234_p9 }
 0x5ac   : > { %1244 = shalt.err (!%p1241_p1)
}
 0x5ad   : > { %s1298_s15 = smov 128   ;;  %s1299_s16 = smov 8  }
 0x5ae   : > { %1152 = dma.vmem_to_hbm [thread:$0]  (%p1370_p4), %s1437_s14, 256, %s1442_s24, %s1446_s25, %s1298_s15, %s1298_s15, %s1299_s16  }
 0x5af PF: > { %p1158_p2 = scmp.ge.s32.totalorder %s1295_s23, 2  ;;  %s888_s17 = sand.u32 1, %s1275_s18  }
 0x5b0   : > { %s889_s27 = scalar_lea.sflag [#allocation4], %s888_s17 }
 0x5b1   : > { %p1155_p3 = pnand %p1158_p2, %p1377_p8 }
 0x5b3   : > { %1270 = dma.done.wait (!%p1155_p3), %s889_s27, 256  }
 0x5b4   : > { %1272 = vsyncadd (!%p1155_p3), %s889_s27, 4294967040  ;;  %s18_s23 = sadd.s32 1, %s1295_s23   ;;  %s1500_s18 = smov %s1279_s19 }
 0x5b5   : > { %p15_p5 = scmp.ge.s32.totalorder %s18_s23, 4   ;;  %s1501_s19 = smov %s1283_s20 }
 0x5b6   : > { %s1502_s20 = smov %s1383_s6  ;;  %s1503_s21 = smov %s1291_s22 }
 0x5b7   : > { %s1504_s22 = smov %s1506_s26  ;;  %17 = sbr.rel (!%p15_p5) target bundleno = 4 (0x4), region = 88 }
 0x5be   :  { %894 = vsyncpa [#allocation4], 1 }
 0x5bf   :  { %896 = vsyncpa [#allocation4 + $0x1], 1 }

</bundles_post_ra>
